<compile_context>
chip_gen: v7x
topology: tpu7x:2x2x1
jax: 0.10.0
libtpu: 0.0.40
codegen_flags: <defaults>
</compile_context>

<pallas_src>
import math

import jax
import jax.numpy as jnp
from jax.experimental import pallas as pl
from jax.experimental.pallas import tpu as pltpu


_NEG_BIG = jnp.float32(-1e30)   # large finite negative instead of -inf (no NaN on masked rows)


def _round_up(x, m):
    return ((x + m - 1) // m) * m


def _pick_tile(tg, tile_cap, batch):
    """Largest Tg tile (multiple of 8, <= tile_cap) that minimizes dead padded rows."""
    tg8 = _round_up(tg, 8)
    tile_cap = max(8, _round_up(tile_cap, 8))
    if tg8 <= tile_cap:
        tile = tg8
    else:
        best_t = tile_cap
        best_pad = _round_up(tg, tile_cap) - tg
        for t in range(tile_cap, max(128, tile_cap // 2) - 1, -8):
            pad = _round_up(tg, t) - tg
            if pad < best_pad:
                best_t, best_pad = t, pad
            if best_pad == 0:
                break
        tile = best_t
    # Keep >=2 Tg tiles when B==1 so both TensorCores (v7x megacore) get work.
    if batch == 1 and tile >= tg8 and tg8 > 8:
        tile = _round_up(max(8, tg8 // 2), 8)
    return tile


# ----------------------------------------------------------------------------------------
# One-time preparation of grid-invariant operands (reuse across decoder layers / steps)
# ----------------------------------------------------------------------------------------

def prepare_encoder_state(encoder_out, encoder_padding_mask, *, compute_dtype=jnp.bfloat16):
    """Pad encoder key/value lane-dense, cast to the MXU compute dtype, and precompute the
    additive mask bias + per-batch sqrt(valid_len). Call once per encoder forward."""
    key, value = encoder_out
    B, E, Ts = key.shape
    E_pad = _round_up(E, 128)
    Ts_pad = _round_up(Ts, 128)

    key_p = jnp.pad(key, ((0, 0), (0, E_pad - E), (0, Ts_pad - Ts))).astype(compute_dtype)
    val_p = jnp.pad(value, ((0, 0), (0, Ts_pad - Ts), (0, E_pad - E))).astype(compute_dtype)

    if encoder_padding_mask is None:
        pad_mask = jnp.broadcast_to(jnp.arange(Ts_pad)[None, :] >= Ts, (B, Ts_pad))
        valid = jnp.full((B,), float(Ts), jnp.float32)
    else:
        pad_mask = jnp.pad(encoder_padding_mask, ((0, 0), (0, Ts_pad - Ts)),
                           constant_values=True)
        valid = jnp.float32(Ts) - jnp.sum(encoder_padding_mask.astype(jnp.float32), axis=1)
    mask_bias = jnp.where(pad_mask, _NEG_BIG, jnp.float32(0.0)).reshape(B, 1, Ts_pad)
    sqrt_s = jnp.sqrt(valid).astype(jnp.float32)    # s * rsqrt(s) == sqrt(s)
    # TODO(synk): valid==0 (fully padded row) yields scale 0 here vs NaN in PyTorch's s*rsqrt(s).
    return {"key": key_p, "value": val_p, "mask_bias": mask_bias, "sqrt_s": sqrt_s,
            "E": E, "Ts": Ts, "E_pad": E_pad, "Ts_pad": Ts_pad}


def prepare_projection_params(params, *, compute_dtype=jnp.bfloat16):
    """Resolve weight-norm, pad lane-dense, cast weights to the MXU dtype. Call once."""
    # TODO(synk): in a real model resolve weight-norm once per train step, not per forward call.
    def wn(v, g):
        return (g / jnp.linalg.norm(v, axis=1))[:, None] * v

    E, C = params["in_v"].shape
    C_pad = _round_up(C, 128)
    E_pad = _round_up(E, 128)
    w_in = wn(params["in_v"], params["in_g"])        # [E, C]
    w_out = wn(params["out_v"], params["out_g"])     # [C, E]
    w_in_t = jnp.pad(w_in.T, ((0, C_pad - C), (0, E_pad - E))).astype(compute_dtype)    # [C_pad, E_pad]
    w_out_t = jnp.pad(w_out.T, ((0, E_pad - E), (0, C_pad - C))).astype(compute_dtype)  # [E_pad, C_pad]
    b_in = jnp.pad(params["in_b"], (0, E_pad - E)).astype(jnp.float32).reshape(1, E_pad)
    b_out = jnp.pad(params["out_b"], (0, C_pad - C)).astype(jnp.float32).reshape(1, C_pad)
    return {"w_in_t": w_in_t, "b_in": b_in, "w_out_t": w_out_t, "b_out": b_out,
            "C": C, "E": E, "C_pad": C_pad, "E_pad": E_pad}


# ----------------------------------------------------------------------------------------
# Kernel
# ----------------------------------------------------------------------------------------

def _make_attention_kernel(need_attn):
    def kernel(scale_ref,                                   # SMEM [B] f32: sqrt(valid_len)
               x_ref, tgt_ref, key_ref, val_ref, mbias_ref,
               w_in_t_ref, b_in_ref, w_out_t_ref, b_out_ref,
               *out_refs):
        b = pl.program_id(0)
        sqrt_half = jnp.float32(math.sqrt(0.5))
        bf16 = jnp.bfloat16

        x = x_ref[0]                              # [Tt, Cp]   residual (permuted + padded)
        tgt = tgt_ref[0].astype(jnp.float32)      # [Tt, Ep]
        kmat = key_ref[0]                         # [Ep, Tsp]  bf16 (wrapper-cast)
        vmat = val_ref[0]                         # [Tsp, Ep]  bf16 (wrapper-cast)
        mbias = mbias_ref[0]                      # [1, Tsp]   0 (valid) / -1e30 (padded)

        # x = (in_projection(x) + target_embedding) * sqrt(0.5) -- bf16 MXU, f32 accumulate
        proj = jnp.dot(x.astype(bf16), w_in_t_ref[...],
                       preferred_element_type=jnp.float32) + b_in_ref[...]
        z = (proj + tgt) * sqrt_half                                  # [Tt, Ep] f32

        # attention logits + additive mask (one VPU add, no compare/select, no inf arithmetic)
        scores = jnp.dot(z.astype(bf16), kmat,
                         preferred_element_type=jnp.float32) + mbias  # [Tt, Tsp]

        # numerically-stable softmax over Ts; EUP reciprocal instead of a VALU divide
        m = jnp.max(scores, axis=-1, keepdims=True)
        e = jnp.exp(scores - m)
        denom = jnp.sum(e, axis=-1, keepdims=True)
        attn = e * pl.reciprocal(denom, approx=True)                  # [Tt, Tsp] f32
        attn_b = attn.astype(bf16)                                    # cast once, reuse below

        out_ref = out_refs[0]
        if need_attn:
            attn_ref = out_refs[1]
            if attn_ref.dtype == jnp.bfloat16:
                attn_ref[0] = attn_b
            else:
                attn_ref[0] = attn.astype(attn_ref.dtype)

        # context + length rescale: x *= s * rsqrt(s) == sqrt(s) (prefetched into SMEM)
        ctx = jnp.dot(attn_b, vmat, preferred_element_type=jnp.float32) * scale_ref[b]

        # x = (out_projection(x) + residual) * sqrt(0.5)
        out = jnp.dot(ctx.astype(bf16), w_out_t_ref[...],
                      preferred_element_type=jnp.float32) + b_out_ref[...]
        out_ref[0] = ((out + x.astype(jnp.float32)) * sqrt_half).astype(out_ref.dtype)
    return kernel


# ----------------------------------------------------------------------------------------
# Wrapper
# ----------------------------------------------------------------------------------------

def attention_layer(x, target_embedding, encoder_out, encoder_padding_mask, params,
                    *, tile_tg=256, need_attn=True, attn_dtype=jnp.bfloat16,
                    prepared_encoder=None, prepared_params=None):
    """Pallas implementation of AttentionLayer.forward.
    Returns (x_out [B,Tg,C], attn [B,Tg,Ts] or None when need_attn=False)."""
    B, C, Tg = x.shape
    out_dtype = x.dtype

    enc = prepared_encoder if prepared_encoder is not None else \
        prepare_encoder_state(encoder_out, encoder_padding_mask)
    prm = prepared_params if prepared_params is not None else \
        prepare_projection_params(params)

    E, Ts = enc["E"], enc["Ts"]
    E_pad, Ts_pad = enc["E_pad"], enc["Ts_pad"]
    C_pad = prm["C_pad"]
    assert prm["C"] == C and prm["E"] == E and prm["E_pad"] == E_pad

    tile = _pick_tile(Tg, tile_tg, B)
    Tg_pad = _round_up(Tg, tile)

    # single fused permute+pad of x into lane-dense [B, Tg_pad, C_pad] (no dtype casts)
    x_t = jnp.pad(jnp.transpose(x, (0, 2, 1)), ((0, 0), (0, Tg_pad - Tg), (0, C_pad - C)))
    tgt_p = jnp.pad(target_embedding, ((0, 0), (0, Tg_pad - Tg), (0, E_pad - E)))

    grid = (B, Tg_pad // tile)

    # Blocks invariant along the Tg axis are single-buffered (no wasted duplicate VMEM).
    in_specs = [
        pl.BlockSpec((1, tile, C_pad), lambda b, t, s: (b, t, 0)),     # x / residual
        pl.BlockSpec((1, tile, E_pad), lambda b, t, s: (b, t, 0)),     # target embedding
        pl.BlockSpec((1, E_pad, Ts_pad), lambda b, t, s: (b, 0, 0),
                     pipeline_mode=pl.Buffered(1)),                    # key   (resident over Tg tiles)
        pl.BlockSpec((1, Ts_pad, E_pad), lambda b, t, s: (b, 0, 0),
                     pipeline_mode=pl.Buffered(1)),                    # value (resident over Tg tiles)
        pl.BlockSpec((1, 1, Ts_pad), lambda b, t, s: (b, 0, 0),
                     pipeline_mode=pl.Buffered(1)),                    # additive mask bias
        pl.BlockSpec((C_pad, E_pad), lambda b, t, s: (0, 0),
                     pipeline_mode=pl.Buffered(1)),                    # in_projection W^T (bf16)
        pl.BlockSpec((1, E_pad), lambda b, t, s: (0, 0)),              # in_projection bias (f32)
        pl.BlockSpec((E_pad, C_pad), lambda b, t, s: (0, 0),
                     pipeline_mode=pl.Buffered(1)),                    # out_projection W^T (bf16)
        pl.BlockSpec((1, C_pad), lambda b, t, s: (0, 0)),              # out_projection bias (f32)
    ]
    out_specs = [pl.BlockSpec((1, tile, C_pad), lambda b, t, s: (b, t, 0))]
    out_shapes = [jax.ShapeDtypeStruct((B, Tg_pad, C_pad), out_dtype)]
    if need_attn:
        out_specs.append(pl.BlockSpec((1, tile, Ts_pad), lambda b, t, s: (b, t, 0)))
        out_shapes.append(jax.ShapeDtypeStruct((B, Tg_pad, Ts_pad), attn_dtype))

    # Explicit VMEM budget: blocks x buffer-count + intermediates, with headroom.
    def _isz(dt):
        return jnp.dtype(dt).itemsize

    blk_bytes = (
        2 * tile * C_pad * _isz(x_t.dtype)                     # x (double-buffered)
        + 2 * tile * E_pad * _isz(tgt_p.dtype)                 # target embedding
        + 1 * E_pad * Ts_pad * _isz(enc["key"].dtype)          # key   (Buffered(1))
        + 1 * Ts_pad * E_pad * _isz(enc["value"].dtype)        # value (Buffered(1))
        + 1 * 8 * Ts_pad * 4                                   # mask bias (sublane-padded)
        + 2 * C_pad * E_pad * _isz(prm["w_in_t"].dtype)        # both weights (Buffered(1))
        + 2 * 8 * (E_pad + C_pad) * 4                          # biases
        + 2 * tile * C_pad * _isz(out_dtype)                   # out
        + (2 * tile * Ts_pad * _isz(attn_dtype) if need_attn else 0)
    )
    inter_bytes = tile * Ts_pad * 10 + tile * E_pad * 16       # scores/e/attn, z/ctx live values
    vmem_limit = int((blk_bytes + inter_bytes) * 1.5) + (2 << 20)
    vmem_limit = max(24 << 20, min(vmem_limit, 64 << 20))      # stay within v7x's 64 MiB physical

    results = pl.pallas_call(
        _make_attention_kernel(need_attn),
        out_shape=tuple(out_shapes),
        grid_spec=pltpu.PrefetchScalarGridSpec(
            num_scalar_prefetch=1,                             # sqrt(valid_len) -> SMEM
            grid=grid,
            in_specs=in_specs,
            out_specs=out_specs,
        ),
        compiler_params=pltpu.CompilerParams(
            # both grid axes independent -> shard across both TensorCores (v7x) / megacore
            dimension_semantics=("parallel", "parallel"),
            vmem_limit_bytes=vmem_limit,
        ),
    )(enc["sqrt_s"], x_t, tgt_p, enc["key"], enc["value"], enc["mask_bias"],
      prm["w_in_t"], prm["b_in"], prm["w_out_t"], prm["b_out"])

    if need_attn:
        out_p, attn_p = results
        return out_p[:, :Tg, :C], attn_p[:, :Tg, :Ts]
    out_p = results[0]
    return out_p[:, :Tg, :C], None


# ----------------------------------------------------------------------------------------
# Pure-JAX reference (mirrors the PyTorch forward) and demo
# ----------------------------------------------------------------------------------------

def _reference(x, target_embedding, encoder_out, encoder_padding_mask, params):
    key, value = encoder_out
    B, C, Tg = x.shape
    Ts = key.shape[-1]

    def wn(v, g):
        return (g / jnp.linalg.norm(v, axis=1))[:, None] * v

    w_in = wn(params["in_v"], params["in_g"])
    w_out = wn(params["out_v"], params["out_g"])

    xt = jnp.transpose(x, (0, 2, 1))
    residual = xt
    z = (jnp.einsum("btc,ec->bte", xt, w_in) + params["in_b"] + target_embedding) * math.sqrt(0.5)
    scores = jnp.einsum("bte,bes->bts", z, key)
    scores = jnp.where(encoder_padding_mask[:, None, :], -jnp.inf, scores)
    attn = jax.nn.softmax(scores, axis=2)
    ctx = jnp.einsum("bts,bse->bte", attn, value)
    s = Ts - jnp.sum(encoder_padding_mask.astype(ctx.dtype), axis=1, keepdims=True)
    s = s[:, :, None]
    ctx = ctx * (s * jax.lax.rsqrt(s))
    out = (jnp.einsum("bte,ce->btc", ctx, w_out) + params["out_b"] + residual) * math.sqrt(0.5)
    return out, attn


if __name__ == "__main__":
    B, C, E, Tg, Ts = 2, 4, 32, 8, 16

    root = jax.random.PRNGKey(0)
    keys = jax.random.split(root, 10)

    in_v = jax.random.normal(keys[0], (E, C), jnp.float32) * math.sqrt(1.0 / C)
    out_v = jax.random.normal(keys[1], (C, E), jnp.float32) * math.sqrt(1.0 / E)
    params = {
        "in_v": in_v,
        "in_g": jnp.linalg.norm(in_v, axis=1),    # weight_norm init: g = ||v||
        "in_b": jnp.zeros((E,), jnp.float32),
        "out_v": out_v,
        "out_g": jnp.linalg.norm(out_v, axis=1),
        "out_b": jnp.zeros((C,), jnp.float32),
    }

    x = jax.random.normal(keys[2], (B, C, Tg), jnp.float32)
    target_embedding = jax.random.normal(keys[3], (B, Tg, E), jnp.float32)
    attn_key = jax.random.normal(keys[4], (B, E, Ts), jnp.float32)
    attn_value = jax.random.normal(keys[5], (B, Ts, E), jnp.float32)
    pos = jnp.arange(Ts)[None, :]
    lengths = jnp.array([Ts - 3, Ts - 5])[:, None]
    encoder_padding_mask = pos >= lengths          # [B, Ts] bool, True = padded

    # Grid-invariant encoder state / projection params prepared once and reused.
    enc_state = prepare_encoder_state((attn_key, attn_value), encoder_padding_mask)
    proj_params = prepare_projection_params(params)

    out, attn = attention_layer(x, target_embedding, (attn_key, attn_value),
                                encoder_padding_mask, params,
                                prepared_encoder=enc_state, prepared_params=proj_params)
    out = jax.block_until_ready(out)
    attn = jax.block_until_ready(attn)

    ref_out, ref_attn = _reference(x, target_embedding, (attn_key, attn_value),
                                   encoder_padding_mask, params)
    assert out.shape == (B, Tg, C) and attn.shape == (B, Tg, Ts)
    # tolerances account for bf16 MXU operands / bf16 attn output vs the f32 reference
    assert jnp.allclose(out, ref_out, atol=5e-2, rtol=5e-2)
    assert jnp.allclose(attn.astype(jnp.float32), ref_attn, atol=5e-2, rtol=5e-2)

    print("KERNEL_OK")
</pallas_src>

<mosaic_0001>
module attributes {stable_mosaic.version = 11 : i64} {
  func.func @kernel(%arg0: i32, %arg1: i32, %arg2: memref<2xf32, #tpu.memory_space<smem>>, %arg3: memref<1x8x128xf32, #tpu.memory_space<vmem>>, %arg4: memref<1x8x128xf32, #tpu.memory_space<vmem>>, %arg5: memref<1x128x128xbf16, #tpu.memory_space<vmem>>, %arg6: memref<1x128x128xbf16, #tpu.memory_space<vmem>>, %arg7: memref<1x1x128xf32, #tpu.memory_space<vmem>>, %arg8: memref<128x128xbf16, #tpu.memory_space<vmem>>, %arg9: memref<1x128xf32, #tpu.memory_space<vmem>>, %arg10: memref<128x128xbf16, #tpu.memory_space<vmem>>, %arg11: memref<1x128xf32, #tpu.memory_space<vmem>>, %arg12: memref<1x8x128xf32, #tpu.memory_space<vmem>>, %arg13: memref<1x8x128xbf16, #tpu.memory_space<vmem>>) attributes {dimension_semantics = [#tpu.dimension_semantics<parallel>, #tpu.dimension_semantics<parallel>], iteration_bounds = array<i64: 2, 1>, scalar_prefetch = 1 : i64, scratch_operands = 0 : i64, tpu.core_type = #tpu.core_type<tc>, window_params = [{transform_indices = @transform_0, window_bounds = array<i64: 1, 8, 128>}, {transform_indices = @transform_1, window_bounds = array<i64: 1, 8, 128>}, {pipeline_mode = #tpu.pipeline_mode<synchronous>, transform_indices = @transform_2, window_bounds = array<i64: 1, 128, 128>}, {pipeline_mode = #tpu.pipeline_mode<synchronous>, transform_indices = @transform_3, window_bounds = array<i64: 1, 128, 128>}, {pipeline_mode = #tpu.pipeline_mode<synchronous>, transform_indices = @transform_4, window_bounds = array<i64: 1, 1, 128>}, {pipeline_mode = #tpu.pipeline_mode<synchronous>, transform_indices = @transform_5, window_bounds = array<i64: 128, 128>}, {pipeline_mode = #tpu.pipeline_mode<synchronous>, transform_indices = @transform_6, window_bounds = array<i64: 1, 128>}, {pipeline_mode = #tpu.pipeline_mode<synchronous>, transform_indices = @transform_7, window_bounds = array<i64: 128, 128>}, {pipeline_mode = #tpu.pipeline_mode<synchronous>, transform_indices = @transform_8, window_bounds = array<i64: 1, 128>}, {transform_indices = @transform_9, window_bounds = array<i64: 1, 8, 128>}, {transform_indices = @transform_10, window_bounds = array<i64: 1, 8, 128>}]} {
    %c0 = arith.constant 0 : index
    %c0_0 = arith.constant 0 : index
    %c0_1 = arith.constant 0 : index
    %0 = vector.load %arg3[%c0, %c0_0, %c0_1] : memref<1x8x128xf32, #tpu.memory_space<vmem>>, vector<1x8x128xf32>
    %1 = vector.shape_cast %0 : vector<1x8x128xf32> to vector<8x128xf32>
    %c0_2 = arith.constant 0 : index
    %c0_3 = arith.constant 0 : index
    %c0_4 = arith.constant 0 : index
    %2 = vector.load %arg4[%c0_2, %c0_3, %c0_4] : memref<1x8x128xf32, #tpu.memory_space<vmem>>, vector<1x8x128xf32>
    %3 = vector.shape_cast %2 : vector<1x8x128xf32> to vector<8x128xf32>
    %c0_5 = arith.constant 0 : index
    %c0_6 = arith.constant 0 : index
    %c0_7 = arith.constant 0 : index
    %4 = vector.load %arg5[%c0_5, %c0_6, %c0_7] : memref<1x128x128xbf16, #tpu.memory_space<vmem>>, vector<1x128x128xbf16>
    %5 = vector.shape_cast %4 : vector<1x128x128xbf16> to vector<128x128xbf16>
    %c0_8 = arith.constant 0 : index
    %c0_9 = arith.constant 0 : index
    %c0_10 = arith.constant 0 : index
    %6 = vector.load %arg6[%c0_8, %c0_9, %c0_10] : memref<1x128x128xbf16, #tpu.memory_space<vmem>>, vector<1x128x128xbf16>
    %7 = vector.shape_cast %6 : vector<1x128x128xbf16> to vector<128x128xbf16>
    %c0_11 = arith.constant 0 : index
    %c0_12 = arith.constant 0 : index
    %c0_13 = arith.constant 0 : index
    %8 = vector.load %arg7[%c0_11, %c0_12, %c0_13] : memref<1x1x128xf32, #tpu.memory_space<vmem>>, vector<1x1x128xf32>
    %9 = vector.shape_cast %8 : vector<1x1x128xf32> to vector<1x128xf32>
    %10 = arith.truncf %1 : vector<8x128xf32> to vector<8x128xbf16>
    %c0_14 = arith.constant 0 : index
    %c0_15 = arith.constant 0 : index
    %11 = vector.load %arg8[%c0_14, %c0_15] : memref<128x128xbf16, #tpu.memory_space<vmem>>, vector<128x128xbf16>
    %cst = arith.constant dense<0.000000e+00> : vector<8x128xf32>
    %12 = tpu.matmul %10, %11, %cst {dimension_numbers = #tpu.dot_dimension_numbers<[1], [0], [0], [1], [0, 0, 1, 1], [], []>} : vector<8x128xbf16>, vector<128x128xbf16>, vector<8x128xf32> -> vector<8x128xf32>
    %c0_16 = arith.constant 0 : index
    %c0_17 = arith.constant 0 : index
    %13 = vector.load %arg9[%c0_16, %c0_17] : memref<1x128xf32, #tpu.memory_space<vmem>>, vector<1x128xf32>
    %14 = vector.broadcast %13 : vector<1x128xf32> to vector<8x128xf32>
    %15 = arith.addf %12, %14 : vector<8x128xf32>
    %16 = arith.addf %15, %3 : vector<8x128xf32>
    %cst_18 = arith.constant 0.707106769 : f32
    %17 = vector.broadcast %cst_18 : f32 to vector<8x128xf32>
    %18 = arith.mulf %16, %17 : vector<8x128xf32>
    %19 = arith.truncf %18 : vector<8x128xf32> to vector<8x128xbf16>
    %cst_19 = arith.constant dense<0.000000e+00> : vector<8x128xf32>
    %20 = tpu.matmul %19, %5, %cst_19 {dimension_numbers = #tpu.dot_dimension_numbers<[1], [0], [0], [1], [0, 0, 1, 1], [], []>} : vector<8x128xbf16>, vector<128x128xbf16>, vector<8x128xf32> -> vector<8x128xf32>
    %21 = vector.broadcast %9 : vector<1x128xf32> to vector<8x128xf32>
    %22 = arith.addf %20, %21 : vector<8x128xf32>
    %cst_20 = arith.constant dense<0xFF800000> : vector<8xf32>
    %23 = vector.multi_reduction <maximumf>, %22, %cst_20 [1] : vector<8x128xf32> to vector<8xf32>
    %24 = vector.shape_cast %23 : vector<8xf32> to vector<8x1xf32>
    %25 = vector.broadcast %24 : vector<8x1xf32> to vector<8x128xf32>
    %26 = arith.subf %22, %25 : vector<8x128xf32>
    %27 = math.exp %26 : vector<8x128xf32>
    %cst_21 = arith.constant dense<0.000000e+00> : vector<8xf32>
    %28 = vector.multi_reduction <add>, %27, %cst_21 [1] : vector<8x128xf32> to vector<8xf32>
    %29 = vector.shape_cast %28 : vector<8xf32> to vector<8x1xf32>
    %30 = tpu.reciprocal %29 {approx = true} : vector<8x1xf32> -> vector<8x1xf32>
    %31 = vector.broadcast %30 : vector<8x1xf32> to vector<8x128xf32>
    %32 = arith.mulf %27, %31 : vector<8x128xf32>
    %33 = arith.truncf %32 : vector<8x128xf32> to vector<8x128xbf16>
    %c0_22 = arith.constant 0 : index
    %c0_23 = arith.constant 0 : index
    %c0_24 = arith.constant 0 : index
    %34 = vector.load %arg13[%c0_22, %c0_23, %c0_24] : memref<1x8x128xbf16, #tpu.memory_space<vmem>>, vector<1x8x128xbf16>
    %35 = vector.shape_cast %34 : vector<1x8x128xbf16> to vector<8x128xbf16>
    %36 = vector.shape_cast %33 : vector<8x128xbf16> to vector<1x8x128xbf16>
    tpu.vector_store %arg13[%c0_22, %c0_23, %c0_24], %36 {strides = array<i32>} : memref<1x8x128xbf16, #tpu.memory_space<vmem>>, vector<1x8x128xbf16>,
    %cst_25 = arith.constant dense<0.000000e+00> : vector<8x128xf32>
    %37 = tpu.matmul %33, %7, %cst_25 {dimension_numbers = #tpu.dot_dimension_numbers<[1], [0], [0], [1], [0, 0, 1, 1], [], []>} : vector<8x128xbf16>, vector<128x128xbf16>, vector<8x128xf32> -> vector<8x128xf32>
    %38 = arith.index_cast %arg0 : i32 to index
    %39 = memref.load %arg2[%38] : memref<2xf32, #tpu.memory_space<smem>>
    %40 = vector.broadcast %39 : f32 to vector<8x128xf32>
    %41 = arith.mulf %37, %40 : vector<8x128xf32>
    %42 = arith.truncf %41 : vector<8x128xf32> to vector<8x128xbf16>
    %c0_26 = arith.constant 0 : index
    %c0_27 = arith.constant 0 : index
    %43 = vector.load %arg10[%c0_26, %c0_27] : memref<128x128xbf16, #tpu.memory_space<vmem>>, vector<128x128xbf16>
    %cst_28 = arith.constant dense<0.000000e+00> : vector<8x128xf32>
    %44 = tpu.matmul %42, %43, %cst_28 {dimension_numbers = #tpu.dot_dimension_numbers<[1], [0], [0], [1], [0, 0, 1, 1], [], []>} : vector<8x128xbf16>, vector<128x128xbf16>, vector<8x128xf32> -> vector<8x128xf32>
    %c0_29 = arith.constant 0 : index
    %c0_30 = arith.constant 0 : index
    %45 = vector.load %arg11[%c0_29, %c0_30] : memref<1x128xf32, #tpu.memory_space<vmem>>, vector<1x128xf32>
    %46 = vector.broadcast %45 : vector<1x128xf32> to vector<8x128xf32>
    %47 = arith.addf %44, %46 : vector<8x128xf32>
    %48 = arith.addf %47, %1 : vector<8x128xf32>
    %cst_31 = arith.constant 0.707106769 : f32
    %49 = vector.broadcast %cst_31 : f32 to vector<8x128xf32>
    %50 = arith.mulf %48, %49 : vector<8x128xf32>
    %c0_32 = arith.constant 0 : index
    %c0_33 = arith.constant 0 : index
    %c0_34 = arith.constant 0 : index
    %51 = vector.load %arg12[%c0_32, %c0_33, %c0_34] : memref<1x8x128xf32, #tpu.memory_space<vmem>>, vector<1x8x128xf32>
    %52 = vector.shape_cast %51 : vector<1x8x128xf32> to vector<8x128xf32>
    %53 = vector.shape_cast %50 : vector<8x128xf32> to vector<1x8x128xf32>
    tpu.vector_store %arg12[%c0_32, %c0_33, %c0_34], %53 {strides = array<i32>} : memref<1x8x128xf32, #tpu.memory_space<vmem>>, vector<1x8x128xf32>,
    return
  }
  func.func @transform_0(%arg0: i32, %arg1: i32, %arg2: memref<2xf32, #tpu.memory_space<smem>>) -> (i32, i32, i32) {
    %c0_i32 = arith.constant 0 : i32
    %c0_i32_0 = arith.constant 0 : i32
    return %arg0, %arg1, %c0_i32 : i32, i32, i32
  }
  func.func @transform_1(%arg0: i32, %arg1: i32, %arg2: memref<2xf32, #tpu.memory_space<smem>>) -> (i32, i32, i32) {
    %c0_i32 = arith.constant 0 : i32
    %c0_i32_0 = arith.constant 0 : i32
    return %arg0, %arg1, %c0_i32 : i32, i32, i32
  }
  func.func @transform_2(%arg0: i32, %arg1: i32, %arg2: memref<2xf32, #tpu.memory_space<smem>>) -> (i32, i32, i32) {
    %c0_i32 = arith.constant 0 : i32
    %c0_i32_0 = arith.constant 0 : i32
    %c0_i32_1 = arith.constant 0 : i32
    return %arg0, %c0_i32, %c0_i32_0 : i32, i32, i32
  }
  func.func @transform_3(%arg0: i32, %arg1: i32, %arg2: memref<2xf32, #tpu.memory_space<smem>>) -> (i32, i32, i32) {
    %c0_i32 = arith.constant 0 : i32
    %c0_i32_0 = arith.constant 0 : i32
    %c0_i32_1 = arith.constant 0 : i32
    return %arg0, %c0_i32, %c0_i32_0 : i32, i32, i32
  }
  func.func @transform_4(%arg0: i32, %arg1: i32, %arg2: memref<2xf32, #tpu.memory_space<smem>>) -> (i32, i32, i32) {
    %c0_i32 = arith.constant 0 : i32
    %c0_i32_0 = arith.constant 0 : i32
    %c0_i32_1 = arith.constant 0 : i32
    return %arg0, %c0_i32, %c0_i32_0 : i32, i32, i32
  }
  func.func @transform_5(%arg0: i32, %arg1: i32, %arg2: memref<2xf32, #tpu.memory_space<smem>>) -> (i32, i32) {
    %c0_i32 = arith.constant 0 : i32
    %c0_i32_0 = arith.constant 0 : i32
    %c0_i32_1 = arith.constant 0 : i32
    return %c0_i32, %c0_i32_0 : i32, i32
  }
  func.func @transform_6(%arg0: i32, %arg1: i32, %arg2: memref<2xf32, #tpu.memory_space<smem>>) -> (i32, i32) {
    %c0_i32 = arith.constant 0 : i32
    %c0_i32_0 = arith.constant 0 : i32
    %c0_i32_1 = arith.constant 0 : i32
    return %c0_i32, %c0_i32_0 : i32, i32
  }
  func.func @transform_7(%arg0: i32, %arg1: i32, %arg2: memref<2xf32, #tpu.memory_space<smem>>) -> (i32, i32) {
    %c0_i32 = arith.constant 0 : i32
    %c0_i32_0 = arith.constant 0 : i32
    %c0_i32_1 = arith.constant 0 : i32
    return %c0_i32, %c0_i32_0 : i32, i32
  }
  func.func @transform_8(%arg0: i32, %arg1: i32, %arg2: memref<2xf32, #tpu.memory_space<smem>>) -> (i32, i32) {
    %c0_i32 = arith.constant 0 : i32
    %c0_i32_0 = arith.constant 0 : i32
    %c0_i32_1 = arith.constant 0 : i32
    return %c0_i32, %c0_i32_0 : i32, i32
  }
  func.func @transform_9(%arg0: i32, %arg1: i32, %arg2: memref<2xf32, #tpu.memory_space<smem>>) -> (i32, i32, i32) {
    %c0_i32 = arith.constant 0 : i32
    %c0_i32_0 = arith.constant 0 : i32
    return %arg0, %arg1, %c0_i32 : i32, i32, i32
  }
  func.func @transform_10(%arg0: i32, %arg1: i32, %arg2: memref<2xf32, #tpu.memory_space<smem>>) -> (i32, i32, i32) {
    %c0_i32 = arith.constant 0 : i32
    %c0_i32_0 = arith.constant 0 : i32
    return %arg0, %arg1, %c0_i32 : i32, i32, i32
  }
}

</mosaic_0001>

<bundles_post_ra>
// kernel: tpu_custom_call.1
= control target key start
LH: loop header
LB: loop body
LE: loop exit
PB: predicated region body
PF: predicated region fallthrough
CT: control target
= control target key end

     0   :  { %s2415_s0 = inlined_call_operand.hbm [shape: f32[2], index: 0, kind: input, shape index: {}]   ;;  %s2416_s1 = inlined_call_operand.hbm [shape: f32[2,8,128], index: 1, kind: input, shape index: {}]   ;;  %s2417_s2 = inlined_call_operand.hbm [shape: f32[2,8,128], index: 2, kind: input, shape index: {}]   ;;  %s2418_s3 = inlined_call_operand.hbm [shape: bf16[2,128,128], index: 3, kind: input, shape index: {}]   ;;  %s2419_s4 = inlined_call_operand.hbm [shape: bf16[2,128,128], index: 4, kind: input, shape index: {}]   ;;  %s2420_s5 = inlined_call_operand.vmem [shape: f32[2,1,128], index: 5, kind: input, shape index: {}]   ;;  %s2421_s6 = inlined_call_operand.hbm [shape: bf16[128,128], index: 6, kind: input, shape index: {}]   ;;  %s2422_s7 = inlined_call_operand.vmem [shape: f32[1,128], index: 7, kind: input, shape index: {}]   ;;  %s2423_s8 = inlined_call_operand.hbm [shape: bf16[128,128], index: 8, kind: input, shape index: {}]   ;;  %s2424_s9 = inlined_call_operand.vmem [shape: f32[1,128], index: 9, kind: input, shape index: {}]   ;;  %s2425_s10 = inlined_call_operand.hbm [shape: f32[2,8,128], index: 10, kind: output, shape index: {0}]   ;;  %s2426_s11 = inlined_call_operand.hbm [shape: bf16[2,8,128], index: 11, kind: output, shape index: {1}]  }
   0x1   :  { %2438 = sst [smem:[#allocation29_spill]] %s2418_s3  ;;  %s1551_s19 = scalar_lea.hbm %s2415_s0, 16 }
   0x2   :  { %2439 = sst [smem:[#allocation30_spill]] %s2419_s4  ;;  %p1552_p0 = scmp.ne.s32.totalorder %s2415_s0, %s1551_s19 }
   0x3   :  { %2440 = sst [smem:[#allocation31_spill]] %s2421_s6  ;;  %p1555_p1 = scmp.lt.u32.totalorder %s1551_s19, %s2415_s0 }
   0x4   :  { %2441 = sst [smem:[#allocation32_spill]] %s2423_s8 }
   0x5   :  { %2442 = sst [smem:[#allocation33_spill]] %s2424_s9  ;;  %p1557_p2 = pnand %p1555_p1, %p1552_p0 }
   0x6   :  { %2443 = sst [smem:[#allocation34_spill]] %s2425_s10 }
   0x7   :  { %2444 = sst [smem:[#allocation35_spill]] %s2426_s11 }
   0x8   :  { %1560 = shalt.err (!%p1557_p2)  }
   0x9   :  { %s1875_s24 = smov [#allocation3]  }
   0xa   :  { %18 = dma.hbm_to_smem %s2415_s0, 16, %s1875_s24, [#allocation2] }
   0xb   :  { %1817 = dma.done.wait [#allocation2], 16 }
   0xc   :  { %1818 = vsyncadd [#allocation2], 4294967280 }
   0xd   :  { %20 = sfence }
   0xe   :  { %21 = vsyncpa [#allocation5], 0 }
   0xf   :  { %23 = vsyncpa [#allocation5 + $0x1], 0 }
  0x10   :  { %24 = vsyncpa [#allocation8], 0 }
  0x11   :  { %26 = vsyncpa [#allocation8 + $0x1], 0 }
  0x12   :  { %27 = vsyncpa [#allocation11], 0 }
  0x13   :  { %28 = vsyncpa [#allocation14], 0 }
  0x14   :  { %29 = vsyncpa [#allocation6], 0 }
  0x15   :  { %31 = vsyncpa [#allocation6 + $0x1], 0 }
  0x16   :  { %32 = vsyncpa [#allocation17], 0 }
  0x17   :  { %34 = vsyncpa [#allocation17 + $0x1], 0  ;;  %s1960_s27 = smov 0   ;;  %s1962_s28 = smov 0  }
  0x18   :  { %s1964_s29 = smov 0   ;;  %s1966_s0 = smov 0  }
  0x19   :  { %s1968_s30 = smov 0   ;;  %s1970_s12 = smov 0  }
  0x1a LB: > { %2445 = sst [smem:[#allocation27_spill]] %s1853_s27  ;;  %s1991_s13 = sadd.s32 4294967295, %s1873_s12   ;;  %s1873_s12 = sphi %s1970_s12, %s40_s12   ;;  %s1869_s30 = sphi %s1968_s30, %s2481_s30   ;;  %s1865_s0 = sphi %s1966_s0, %s2480_s0   ;;  %s1861_s29 = sphi %s1964_s29, %s2479_s29   ;;  %s1857_s28 = sphi %s1962_s28, %s2478_s28   ;;  %s1853_s27 = sphi %s1960_s27, %s2477_s27  }
  0x1b   : > { %s1226_s14 = sadd.s32 4294967294, %s1873_s12   ;;  %p74_p3 = scmp.ne.s32.totalorder %s1857_s28, %s1853_s27 }
  0x1c   : > { %p2431_p4 = scmp.eq.s32.totalorder %s1991_s13, 0  ;;  %p296_p5 = scmp.eq.s32.totalorder %s1226_s14, 1 }
  0x1d   : > { %p1227_p6 = scmp.ge.s32.totalorder %s1873_s12, 1  ;;  %p331_p8 = scmp.lt.s32.totalorder %s1873_s12, 3 }
  0x1e   : > { %p2000_p7 = por %p2431_p4, %p74_p3  ;;  %p2005_p9 = por %p296_p5, %p74_p3 }
  0x1f   : > { %s1287_s17 = sshll.u32 %s1865_s0, 10  ;;  %p2010_p10 = pnand %p1227_p6, %p331_p8 }
  0x20   : > { %s2446_s15 = scalar_select %p2000_p7, 1, 0 }
  0x21   : > { %s2447_s16 = scalar_select %p2005_p9, 1, 0 }
  0x22   : > { %s2449_s18 = scalar_select %p2010_p10, 1, 0 }
  0x23   : > { %2448 = sst [smem:[#allocation28_spill]] %s2447_s16  ;;  %p2430_p11 = pneg %p2010_p10 }
  0x24   : > { %s2450_s3 = sld [smem:[#allocation29_spill]]  ;;  %s1876_s22 = smov [#allocation9]  }
  0x25   : > { %s346_s23 = sshll.u32 %s1876_s22, 4  ;;  %p2028_p12 = pnand %p2430_p11, %p2000_p7  ;;  %s2021_s23 = int_to_ptr.vmem [resolvable:$true] %s346_s23 }
  0x26   : > { %s2452_s4 = sld [smem:[#allocation30_spill]] }
  0x27   : > { %p1563_p1 = pneg %p2028_p12 }
  0x2a   : > { %s2017_s21 = scalar_lea.hbm %s2450_s3, %s1287_s17  ;;  %s1566_s16 = scalar_lea.hbm %s2450_s3, 2048 }
  0x2b   : > { %s1561_s19 = scalar_lea.hbm %s2017_s21, 1024  ;;  %p1567_p5 = scmp.lt.u32.totalorder %s2017_s21, %s2450_s3 }
  0x2c   : > { %s2036_s14 = scalar_lea.hbm %s2452_s4, %s1287_s17  ;;  %p1562_p0 = scmp.ne.s32.totalorder %s2017_s21, %s1561_s19 }
  0x2d   : > { %p1568_p6 = scmp.lt.u32.totalorder %s1566_s16, %s1561_s19  ;;  %p1570_p13 = scmp.lt.u32.totalorder %s1561_s19, %s2017_s21 }
  0x2e   : > { %p1564_p2 = pnand %p1563_p1, %p1562_p0 }
  0x2f   : > { %p1569_p8 = por %p1568_p6, %p1567_p5 }
  0x30   : > { %p1565_p3 = pneg %p1564_p2 }
  0x31   : > { %p1571_p11 = por %p1570_p13, %p1569_p8 }
  0x33   : > { %p1572_p4 = pnand %p1571_p11, %p1565_p3 }
  0x35   : > { %1575 = shalt.err (!%p1572_p4)
}
  0x36   : > { %s1576_s17 = scalar_lea.vmem %s2021_s23, 1024  ;;  %p1584_p7 = scmp.lt.s32.totalorder %s2021_s23, %s2021_s23 }
  0x37   : > { %p1577_p0 = scmp.ne.s32.totalorder %s2021_s23, %s1576_s17  ;;  %p1585_p10 = scmp.lt.s32.totalorder %s1576_s17, %s1576_s17 }
  0x39   : > { %p1579_p2 = pnand %p1577_p0, %p1563_p1  ;;  %p1586_p5 = por %p1585_p10, %p1584_p7 }
  0x3b   : > { %p1580_p9 = pneg %p1579_p2 }
  0x3d   : > { %p1587_p6 = pnand %p1586_p5, %p1580_p9 }
  0x3f   : > { %1590 = shalt.err (!%p1587_p6)
}
  0x40   : > { %s1877_s10 = smov 64   ;;  %s1878_s27 = smov 4  }
  0x41   : > { %1428 = dma.hbm_to_vmem [thread:$0]  (!%p2028_p12), %s2017_s21, 1024, %s2021_s23, [#allocation8], %s1877_s10, %s1877_s10, %s1878_s27  }
  0x42   : > { %s1879_s16 = smov [#allocation10]   ;;  %s1880_s26 = smov [#allocation12]  }
  0x43   : > { %s362_s25 = sshll.u32 %s1879_s16, 4  ;;  %s381_s19 = sshll.u32 %s1880_s26, 4  ;;  %s363_s25 = int_to_ptr.vmem [resolvable:$true] %s362_s25  ;;  %s382_s19 = int_to_ptr.vmem [resolvable:$true] %s381_s19 }
  0x44   : > { %s1591_s20 = scalar_lea.hbm %s2036_s14, 1024  ;;  %s1596_s3 = scalar_lea.hbm %s2452_s4, 2048 }
  0x45   : > { %p1592_p4 = scmp.ne.s32.totalorder %s2036_s14, %s1591_s20  ;;  %p1597_p10 = scmp.lt.u32.totalorder %s2036_s14, %s2452_s4 }
  0x46   : > { %p1598_p11 = scmp.lt.u32.totalorder %s1596_s3, %s1591_s20  ;;  %p1600_p3 = scmp.lt.u32.totalorder %s1591_s20, %s2036_s14 }
  0x47   : > { %p1594_p7 = pnand %p1592_p4, %p1563_p1 }
  0x48   : > { %p1599_p13 = por %p1598_p11, %p1597_p10 }
  0x49   : > { %p1595_p9 = pneg %p1594_p7 }
  0x4a   : > { %p1601_p8 = por %p1600_p3, %p1599_p13 }
  0x4c   : > { %p1602_p0 = pnand %p1601_p8, %p1595_p9 }
  0x4e   : > { %1605 = shalt.err (!%p1602_p0)
}
  0x4f   : > { %s1606_s21 = scalar_lea.vmem %s363_s25, 1024  ;;  %p1614_p4 = scmp.lt.s32.totalorder %s363_s25, %s363_s25 }
  0x50   : > { %p1607_p2 = scmp.ne.s32.totalorder %s363_s25, %s1606_s21  ;;  %p1615_p7 = scmp.lt.s32.totalorder %s1606_s21, %s1606_s21 }
  0x52   : > { %p1609_p5 = pnand %p1607_p2, %p1563_p1  ;;  %p1616_p10 = por %p1615_p7, %p1614_p4 }
  0x54   : > { %p1610_p6 = pneg %p1609_p5 }
  0x56   : > { %p1617_p11 = pnand %p1616_p10, %p1610_p6 }
  0x58   : > { %1620 = shalt.err (!%p1617_p11)
}
  0x59   : > { %1431 = dma.hbm_to_vmem [thread:$0]  (!%p2028_p12), %s2036_s14, 1024, %s363_s25, [#allocation11], %s1877_s10, %s1877_s10, %s1878_s27  }
  0x5a   : > { %p2453_p9 = scmp.eq.s32.totalorder %s1991_s13, 0  ;;  %p2454_p13 = scmp.ne.s32.totalorder %s2449_s18, 0 }
  0x5b   : > { %s1881_s9 = smov [#allocation13]   ;;  %s2457_s6 = sld [smem:[#allocation31_spill]] }
  0x5c   : > { %p2455_p3 = pneg %p2454_p13  ;;  %s397_s11 = sshll.u32 %s1881_s9, 4  ;;  %s398_s11 = int_to_ptr.vmem [resolvable:$true] %s397_s11 }
  0x5e   : > { %p2094_p1 = pnand %p2455_p3, %p2453_p9 }
  0x60   : > { %p1623_p8 = pneg %p2094_p1 }
  0x61   : > { %s1621_s16 = scalar_lea.hbm %s2457_s6, 1024 }
  0x62   : > { %p1622_p12 = scmp.ne.s32.totalorder %s2457_s6, %s1621_s16  ;;  %p1628_p5 = scmp.lt.u32.totalorder %s1621_s16, %s2457_s6 }
  0x64   : > { %p1624_p0 = pnand %p1623_p8, %p1622_p12 }
  0x66   : > { %p1625_p2 = pneg %p1624_p0 }
  0x68   : > { %p1630_p6 = pnand %p1628_p5, %p1625_p2 }
  0x6a   : > { %1633 = shalt.err (!%p1630_p6)
}
  0x6b   : > { %s1634_s22 = scalar_lea.vmem %s382_s19, 1024  ;;  %p1642_p11 = scmp.lt.s32.totalorder %s382_s19, %s382_s19 }
  0x6c   : > { %p1635_p4 = scmp.ne.s32.totalorder %s382_s19, %s1634_s22  ;;  %p1643_p9 = scmp.lt.s32.totalorder %s1634_s22, %s1634_s22 }
  0x6e   : > { %p1637_p7 = pnand %p1635_p4, %p1623_p8  ;;  %p1644_p3 = por %p1643_p9, %p1642_p11 }
  0x70   : > { %p1638_p10 = pneg %p1637_p7 }
  0x72   : > { %p1645_p13 = pnand %p1644_p3, %p1638_p10 }
  0x74   : > { %1648 = shalt.err (!%p1645_p13)
}
  0x75   : > { %1434 = dma.hbm_to_vmem [thread:$0]  (!%p2094_p1), %s2457_s6, 1024, %s382_s19, [#allocation11], %s1877_s10, %s1877_s10, %s1878_s27  }
  0x76   : > { %s2458_s8 = sld [smem:[#allocation32_spill]] }
  0x7c   : > { %s1649_s24 = scalar_lea.hbm %s2458_s8, 1024 }
  0x7d   : > { %p1650_p12 = scmp.ne.s32.totalorder %s2458_s8, %s1649_s24  ;;  %p1656_p2 = scmp.lt.u32.totalorder %s1649_s24, %s2458_s8 }
  0x7f   : > { %p1652_p13 = pnand %p1650_p12, %p1623_p8 }
  0x81   : > { %p1653_p0 = pneg %p1652_p13 }
  0x83   : > { %p1658_p5 = pnand %p1656_p2, %p1653_p0 }
  0x85   : > { %1661 = shalt.err (!%p1658_p5)
}
  0x86   : > { %s1662_s19 = scalar_lea.vmem %s398_s11, 1024  ;;  %p1670_p10 = scmp.lt.s32.totalorder %s398_s11, %s398_s11 }
  0x87   : > { %p1663_p6 = scmp.ne.s32.totalorder %s398_s11, %s1662_s19  ;;  %p1671_p11 = scmp.lt.s32.totalorder %s1662_s19, %s1662_s19 }
  0x89   : > { %p1665_p4 = pnand %p1663_p6, %p1623_p8  ;;  %p1672_p9 = por %p1671_p11, %p1670_p10 }
  0x8b   : > { %p1666_p7 = pneg %p1665_p4 }
  0x8d   : > { %p1673_p3 = pnand %p1672_p9, %p1666_p7 }
  0x8f   : > { %1676 = shalt.err (!%p1673_p3)
}
  0x90   : > { %1437 = dma.hbm_to_vmem [thread:$0]  (!%p2094_p1), %s2458_s8, 1024, %s398_s11, [#allocation14], %s1877_s10, %s1877_s10, %s1878_s27  }
  0x91   : > { %s52_s17 = sadd.s32 1, %s1869_s30  ;;  %s61_s3 = sadd.s32 1, %s1861_s29 }
  0x92   : > { %p54_p8 = scmp.ge.s32.totalorder %s52_s17, 2  ;;  %p68_p12 = scmp.ne.s32.totalorder %s1861_s29, %s1857_s28 }
  0x93   : > { %p69_p13 = scmp.eq.s32.totalorder %s1873_s12, 0  ;;  %p290_p0 = scmp.eq.s32.totalorder %s1991_s13, 1 }
  0x94   : > { %s2483_s17 = smov (%p54_p8, %s52_s17), 0  ;;  %p1454_p1 = scmp.lt.s32.totalorder %s1873_s12, 2 }
  0x95   : > { %p2154_p2 = por %p69_p13, %p68_p12  ;;  %p2158_p5 = por %p290_p0, %p68_p12 }
  0x96   : > { %s56_s10 = ssub.s32 %s1869_s30, %s2483_s17  ;;  %s414_s27 = sand.u32 1, %s1861_s29  }
  0x97   : > { %s2460_s9 = scalar_select %p2158_p5, 1, 0 }
  0x98   : > { %p59_p6 = scmp.eq.s32.totalorder %s56_s10, 0  ;;  %s2166_s11 = sshll.u32 %s414_s27, 3 }
  0x99   : > { %s1236_s24 = sshll.u32 %s1869_s30, 7  ;;  %s418_s14 = scalar_lea.vmem [#allocation4], %s2166_s11 }
  0x9a   : > { %s2169_s23 = scalar_select %p59_p6, %s1861_s29, %s61_s3  }
  0x9b   : > { %s2175_s20 = scalar_lea.hbm %s2416_s1, %s1236_s24  ;;  %s426_s19 = sshll.u32 %s418_s14, 4  ;;  %s2178_s19 = int_to_ptr.vmem [resolvable:$true] %s426_s19 }
  0x9c   : > { %p2182_p4 = pnand %p1454_p1, %p2154_p2  ;;  %s2189_s10 = scalar_lea.hbm %s2417_s2, %s1236_s24 }
  0x9d   : > { %s433_s16 = sand.u32 1, %s1873_s12   ;;  %s415_s26 = scalar_lea.sflag [#allocation5], %s414_s27 }
  0x9e   : > { %s1677_s4 = scalar_lea.hbm %s2175_s20, 128  ;;  %p1679_p10 = pneg %p2182_p4 }
  0x9f   : > { %p1678_p7 = scmp.ne.s32.totalorder %s2175_s20, %s1677_s4  ;;  %s1682_s6 = scalar_lea.hbm %s2416_s1, 256 }
  0xa0   : > { %p1683_p3 = scmp.lt.u32.totalorder %s2175_s20, %s2416_s1  ;;  %p1684_p8 = scmp.lt.u32.totalorder %s1682_s6, %s1677_s4 }
  0xa1   : > { %p1680_p11 = pnand %p1679_p10, %p1678_p7  ;;  %p1686_p13 = scmp.lt.u32.totalorder %s1677_s4, %s2175_s20 }
  0xa2   : > { %p1685_p12 = por %p1684_p8, %p1683_p3 }
  0xa3   : > { %p1681_p9 = pneg %p1680_p11 }
  0xa4   : > { %p1687_p0 = por %p1686_p13, %p1685_p12 }
  0xa6   : > { %p1688_p2 = pnand %p1687_p0, %p1681_p9 }
  0xa8   : > { %1691 = shalt.err (!%p1688_p2)
}
  0xa9   : > { %s1692_s27 = scalar_lea.vmem %s2178_s19, 128  ;;  %s1882_s24 = smov [#allocation4]  }
  0xaa   : > { %p1693_p1 = scmp.ne.s32.totalorder %s2178_s19, %s1692_s27  ;;  %s1697_s3 = sshll.u32 %s1882_s24, 4  ;;  %s1698_s3 = int_to_ptr.vmem [resolvable:$false] %s1697_s3 }
  0xab   : > { %s1699_s8 = scalar_lea.vmem %s1698_s3, 256  ;;  %p1700_p11 = scmp.lt.s32.totalorder %s2178_s19, %s1698_s3 }
  0xac   : > { %p1695_p6 = pnand %p1693_p1, %p1679_p10  ;;  %p1701_p3 = scmp.lt.s32.totalorder %s1699_s8, %s1692_s27 }
  0xae   : > { %p1696_p7 = pneg %p1695_p6  ;;  %p1702_p8 = por %p1701_p3, %p1700_p11 }
  0xb0   : > { %p1703_p12 = pnand %p1702_p8, %p1696_p7 }
  0xb2   : > { %1706 = shalt.err (!%p1703_p12)
}
  0xb3   : > { %1441 = dma.hbm_to_vmem [thread:$0]  (!%p2182_p4), %s2175_s20, 128, %s2178_s19, %s415_s26  }
  0xb4   : > { %s437_s4 = scalar_lea.vmem [#allocation7], %s2166_s11  ;;  %s434_s21 = scalar_lea.sflag [#allocation8], %s433_s16 }
  0xb5   : > { %s445_s6 = sshll.u32 %s437_s4, 4  ;;  %s1707_s14 = scalar_lea.hbm %s2189_s10, 128  ;;  %s446_s6 = int_to_ptr.vmem [resolvable:$true] %s445_s6 }
  0xb6   : > { %p1708_p9 = scmp.ne.s32.totalorder %s2189_s10, %s1707_s14  ;;  %s1712_s24 = scalar_lea.hbm %s2417_s2, 256 }
  0xb7   : > { %p1713_p2 = scmp.lt.u32.totalorder %s2189_s10, %s2417_s2  ;;  %p1714_p1 = scmp.lt.u32.totalorder %s1712_s24, %s1707_s14 }
  0xb8   : > { %p1710_p13 = pnand %p1708_p9, %p1679_p10  ;;  %p1716_p7 = scmp.lt.u32.totalorder %s1707_s14, %s2189_s10 }
  0xb9   : > { %p1715_p6 = por %p1714_p1, %p1713_p2 }
  0xba   : > { %p1711_p0 = pneg %p1710_p13 }
  0xbb   : > { %p1717_p11 = por %p1716_p7, %p1715_p6 }
  0xbd   : > { %p1718_p3 = pnand %p1717_p11, %p1711_p0 }
  0xbf   : > { %1721 = shalt.err (!%p1718_p3)
}
  0xc0   : > { %s1722_s11 = scalar_lea.vmem %s446_s6, 128  ;;  %s1883_s20 = smov [#allocation7]  }
  0xc1   : > { %p1723_p8 = scmp.ne.s32.totalorder %s446_s6, %s1722_s11  ;;  %s1727_s19 = sshll.u32 %s1883_s20, 4  ;;  %s1728_s19 = int_to_ptr.vmem [resolvable:$false] %s1727_s19 }
  0xc2   : > { %s1729_s16 = scalar_lea.vmem %s1728_s19, 256  ;;  %p1730_p13 = scmp.lt.s32.totalorder %s446_s6, %s1728_s19 }
  0xc3   : > { %p1725_p12 = pnand %p1723_p8, %p1679_p10  ;;  %p1731_p5 = scmp.lt.s32.totalorder %s1729_s16, %s1722_s11 }
  0xc5   : > { %p1726_p9 = pneg %p1725_p12  ;;  %p1732_p1 = por %p1731_p5, %p1730_p13 }
  0xc7   : > { %p1733_p2 = pnand %p1732_p1, %p1726_p9 }
  0xc9   : > { %1736 = shalt.err (!%p1733_p2)
}
  0xca   : > { %1444 = dma.hbm_to_vmem [thread:$0]  (!%p2182_p4), %s2189_s10, 128, %s446_s6, %s434_s21  }
  0xcb   : > { %p2462_p0 = scmp.ne.s32.totalorder %s2449_s18, 0 }
  0xcc   : > { %s2242_s26 = sand.u32 (!%p2462_p0), 1, %s1857_s28   ;;  %p2463_p5 = scmp.ne.s32.totalorder (!%p2462_p0), %s2446_s15, 0 }
  0xcd   : > { %454 = sbr.rel (%p2462_p0) target bundleno = 1456 (0x5b0), region = 56  ;;  %s2245_s4 = sshll.u32 (!%p2462_p0), %s2242_s26, 3 }
  0xce   : > { %s457_s14 = scalar_lea.sflag (!%p2462_p0), [#allocation5], %s2242_s26  ;;  %s460_s22 = scalar_lea.vmem (!%p2462_p0), [#allocation4], %s2245_s4 }
  0xd4   : > { %1820 = dma.done.wait (%p2463_p5), %s457_s14, 128  }
  0xd5   : > { %1822 = vsyncadd (%p2463_p5), %s457_s14, 4294967168  ;;  %s465_s18 = sand.u32 1, %s1991_s13   ;;  %s469_s10 = scalar_lea.vmem [#allocation7], %s2245_s4 }
  0xd6   : > { %s466_s25 = scalar_lea.sflag [#allocation8], %s465_s18 }
  0xd7   : > { %1824 = dma.done.wait (%p2463_p5), %s466_s25, 128  }
  0xd8   : > { %1826 = vsyncadd (%p2463_p5), %s466_s25, 4294967168 }
  0xd9   : > { %1828 = dma.done.wait (%p2463_p5), [#allocation8], 1024  }
  0xda   : > { %1830 = vsyncadd (%p2463_p5), [#allocation8], 4294966272 }
  0xdb   : > { %1832 = dma.done.wait (%p2463_p5), [#allocation11], 1024  }
  0xdc   : > { %1834 = vsyncadd (%p2463_p5), [#allocation11], 4294966272  ;;  %p2464_p4 = scmp.eq.s32.totalorder %s1991_s13, 0 }
  0xde   : > { %1836 = dma.done.wait (%p2464_p4), [#allocation11], 1024   ;;  %p2465_p10 = pmov %p2464_p4 }
  0xdf   : > { %p2466_p6 = pmov %p2464_p4 }
  0xe0   : > { %1838 = vsyncadd (%p2465_p10), [#allocation11], 4294966272 }
  0xe1   : > { %1840 = dma.done.wait (%p2466_p6), [#allocation14], 1024   ;;  %p2467_p7 = pmov %p2464_p4 }
  0xe2   : > { %v1884_v0 = vmov 0.0   ;;  %vm1885_vm0 = vmmov 0   ;;  %v1515_v1 = vld [vmem:[#allocation12] sm:$0xff]   ;;  %v1516_v2 = vld [vmem:[#allocation12 + $0x8] sm:$0xff]   ;;  %v1517_v3 = vld [vmem:[#allocation12 + $0x10] sm:$0xff]   ;;  %p535_p11 = scmp.lt.s32.totalorder %s1865_s0, 1 }
  0xe3   : > { %1842 = vsyncadd (%p2467_p7), [#allocation14], 4294966272  ;;  %1325 = vmatprep.subr.bf16.mxu0 %v1884_v0  ;;  %1341 = vmatprep.mubr.msk.bf16.mxu0 %vm1885_vm0, %v1884_v0  ;;  %v1523_v4 = vld [vmem:[#allocation9] sm:$0xff]   ;;  %v1518_v5 = vld [vmem:[#allocation12 + $0x18] sm:$0xff]   ;;  %s1245_s3 = sshll.u32 %s2242_s26, 2  ;;  %s882_s11 = sld [smem:[#allocation3 + %s1865_s0]] }
  0xe4   : > { %1345 = vmatprep.subr.bf16.mxu1 %v1884_v0  ;;  %1361 = vmatprep.mubr.msk.bf16.mxu1 %vm1885_vm0, %v1884_v0  ;;  %v1524_v6 = vld [vmem:[#allocation9 + $0x8] sm:$0xff]   ;;  %v1519_v7 = vld [vmem:[#allocation12 + $0x20] sm:$0xff]   ;;  %v1525_v8 = vld [vmem:[#allocation9 + $0x10] sm:$0xff]   ;;  %s536_s6 = scalar_select %p535_p11, %s1865_s0, 1 }
  0xe5   : > { %1326 = vmatpush3.bf16.msra.mxu0 %v1515_v1  ;;  %1346 = vmatpush3.bf16.msra.mxu1 %v1523_v4  ;;  %v1520_v9 = vld [vmem:[#allocation12 + $0x28] sm:$0xff]   ;;  %v1526_v10 = vld [vmem:[#allocation9 + $0x18] sm:$0xff]   ;;  %v1521_v11 = vld [vmem:[#allocation12 + $0x30] sm:$0xff]   ;;  %s534_s8 = scalar_lea.vmem [#allocation16], %s1245_s3  ;;  %s1284_s20 = sshll.u32 %s1865_s0, 6 }
  0xe6   : > { %1327 = vmatprep.subr.bf16.mxu0 %v1884_v0  ;;  %1347 = vmatprep.subr.bf16.mxu1 %v1884_v0  ;;  %v1527_v12 = vld [vmem:[#allocation9 + $0x20] sm:$0xff]   ;;  %v1522_v13 = vld [vmem:[#allocation12 + $0x38] sm:$0xff]   ;;  %v1528_v15 = vld [vmem:[#allocation9 + $0x28] sm:$0xff]   ;;  %s537_s24 = scalar_lea.vmem %s2420_s5, %s536_s6  ;;  %s1034_s19 = sshll.u32 %s534_s8, 4  ;;  %s1035_s19 = int_to_ptr.vmem [resolvable:$true] %s1034_s19 }
  0xe7   : > { %v2292_v14 = vld [vmem:[%s460_s22] sm:$0xff]  ;;  %v1529_v17 = vld [vmem:[#allocation9 + $0x30] sm:$0xff]   ;;  %v1530_v18 = vld [vmem:[#allocation9 + $0x38] sm:$0xff]   ;;  %s2468_s22 = sld [smem:[#allocation35_spill]]  ;;  %s1006_s25 = scalar_lea.sflag [#allocation17], %s2242_s26 }
  0xe8   : > { %v574_v16 = vpack.c.bf16 %v2292_v14, %v2292_v14  ;;  %v1246_v19 = vld [vmem:[%s2422_s7] ss:$0 sm:$0xff]  ;;  %v1531_v35 = vld [vmem:[#allocation10] sm:$0xff]   ;;  %v1532_v36 = vld [vmem:[#allocation10 + $0x8] sm:$0xff]   ;;  %p2469_p8 = scmp.ne.s32.totalorder %s2460_s9, 0  ;;  %s1886_s13 = smov [#allocation16]  }
  0xe9   : > { %1328 = vmatpush3.bf16.msra.mxu0 %v1516_v2  ;;  %1348 = vmatpush3.bf16.msra.mxu1 %v1524_v6  ;;  %v540_v20 = vld [vmem:[%s469_s10] sm:$0xff]  ;;  %v1535_v43 = vld [vmem:[#allocation10 + $0x20] sm:$0xff]   ;;  %v1536_v44 = vld [vmem:[#allocation10 + $0x28] sm:$0xff]   ;;  %v883_v59 = vstv %s882_s11  ;;  %s1737_s10 = scalar_lea.vmem %s1035_s19, 64  ;;  %s1741_s15 = sshll.u32 %s1886_s13, 4  ;;  %s1742_s15 = int_to_ptr.vmem [resolvable:$false] %s1741_s15 }
  0xea   : > { %1329 = vmatprep.subr.bf16.mxu0 %v1884_v0  ;;  %1349 = vmatprep.subr.bf16.mxu1 %v1884_v0  ;;  %v1255_v29 = vld [vmem:[%s537_s24] ss:$0 sm:$0xff]  ;;  %v1533_v37 = vld [vmem:[#allocation10 + $0x10] sm:$0xff]   ;;  %v1539_v47 = vld [vmem:[#allocation13] sm:$0xff]   ;;  %p1738_p3 = scmp.ne.s32.totalorder %s1035_s19, %s1737_s10  ;;  %s1743_s6 = scalar_lea.vmem %s1742_s15, 128 }
  0xeb   : > { %v1534_v38 = vld [vmem:[#allocation10 + $0x18] sm:$0xff]   ;;  %v1537_v45 = vld [vmem:[#allocation10 + $0x30] sm:$0xff]   ;;  %v1540_v48 = vld [vmem:[#allocation13 + $0x8] sm:$0xff]   ;;  %p1744_p13 = scmp.lt.s32.totalorder %s1035_s19, %s1742_s15  ;;  %p1745_p1 = scmp.lt.s32.totalorder %s1743_s6, %s1737_s10 }
  0xec   : > { %v1538_v46 = vld [vmem:[#allocation10 + $0x38] sm:$0xff]   ;;  %v1541_v49 = vld [vmem:[#allocation13 + $0x10] sm:$0xff]   ;;  %v1543_v51 = vld [vmem:[#allocation13 + $0x20] sm:$0xff]   ;;  %p1739_p12 = pnand %p1738_p3, %p2469_p8 }
  0xed   : > { %1330 = vmatpush3.bf16.msra.mxu0 %v1517_v3  ;;  %1350 = vmatpush3.bf16.msra.mxu1 %v1525_v8  ;;  %v1542_v50 = vld [vmem:[#allocation13 + $0x18] sm:$0xff]   ;;  %v1544_v52 = vld [vmem:[#allocation13 + $0x28] sm:$0xff]   ;;  %v1545_v53 = vld [vmem:[#allocation13 + $0x30] sm:$0xff]   ;;  %s2337_s18 = scalar_lea.hbm %s2468_s22, %s1284_s20  ;;  %p1746_p2 = por %p1745_p1, %p1744_p13 }
  0xee   : > { %1331 = vmatprep.subr.bf16.mxu0 %v1884_v0  ;;  %1351 = vmatprep.subr.bf16.mxu1 %v1884_v0  ;;  %v1546_v58 = vld [vmem:[#allocation13 + $0x38] sm:$0xff]   ;;  %p1740_p9 = pneg %p1739_p12 }
  0xf0   : > { %p1747_p0 = pnand %p1746_p2, %p1740_p9 }
  0xf1   : > { %1332 = vmatpush3.bf16.msra.mxu0 %v1518_v5  ;;  %1352 = vmatpush3.bf16.msra.mxu1 %v1526_v10 }
  0xf2   : > { %1333 = vmatprep.subr.bf16.mxu0 %v1884_v0  ;;  %1353 = vmatprep.subr.bf16.mxu1 %v1884_v0 }
  0xf5   : > { %1334 = vmatpush3.bf16.msra.mxu0 %v1519_v7  ;;  %1354 = vmatpush3.bf16.msra.mxu1 %v1527_v12 }
  0xf6   : > { %1335 = vmatprep.subr.bf16.mxu0 %v1884_v0  ;;  %1355 = vmatprep.subr.bf16.mxu1 %v1884_v0 }
  0xf9   : > { %1336 = vmatpush3.bf16.msra.mxu0 %v1520_v9  ;;  %1356 = vmatpush3.bf16.msra.mxu1 %v1528_v15 }
  0xfa   : > { %1337 = vmatprep.subr.bf16.mxu0 %v1884_v0  ;;  %1357 = vmatprep.subr.bf16.mxu1 %v1884_v0 }
  0xfd   : > { %1338 = vmatpush3.bf16.msra.mxu0 %v1521_v11  ;;  %1358 = vmatpush3.bf16.msra.mxu1 %v1529_v17 }
  0xfe   : > { %1339 = vmatprep.subr.bf16.mxu0 %v1884_v0  ;;  %1359 = vmatprep.subr.bf16.mxu1 %v1884_v0 }
 0x101   : > { %1340 = vmatpush3.bf16.msra.mxu0 %v1522_v13  ;;  %1360 = vmatpush3.bf16.msra.mxu1 %v1530_v18 }
 0x102   : > { %1365 = vmatprep.subr.bf16.mxu0 %v1884_v0  ;;  %1385 = vmatprep.subr.bf16.mxu1 %v1884_v0 }
 0x104   : > { %1342 = vmatmul.mubr.bf16.vlgmr.msra.gmra.mrb[0].mxu0 %v574_v16 }
 0x105   : > { %1381 = vmatprep.mubr.msk.bf16.mxu0 %vm1885_vm0, %v1884_v0  ;;  %1366 = vmatpush3.bf16.msra.mxu0 %v1531_v35 }
 0x106   : > { %1367 = vmatprep.subr.bf16.mxu0 %v1884_v0 }
 0x109   : > { %1368 = vmatpush3.bf16.msra.mxu0 %v1532_v36 }
 0x10a   : > { %1369 = vmatprep.subr.bf16.mxu0 %v1884_v0 }
 0x10d   : > { %1370 = vmatpush3.bf16.msra.mxu0 %v1533_v37 }
 0x10e   : > { %1371 = vmatprep.subr.bf16.mxu0 %v1884_v0 }
 0x111   : > { %1372 = vmatpush3.bf16.msra.mxu0 %v1534_v38 }
 0x112   : > { %1373 = vmatprep.subr.bf16.mxu0 %v1884_v0 }
 0x115   : > { %1374 = vmatpush3.bf16.msra.mxu0 %v1535_v43 }
 0x116   : > { %1375 = vmatprep.subr.bf16.mxu0 %v1884_v0 }
 0x119   : > { %1376 = vmatpush3.bf16.msra.mxu0 %v1536_v44 }
 0x11a   : > { %1377 = vmatprep.subr.bf16.mxu0 %v1884_v0 }
 0x11d   : > { %1378 = vmatpush3.bf16.msra.mxu0 %v1537_v45 }
 0x11e   : > { %1379 = vmatprep.subr.bf16.mxu0 %v1884_v0 }
 0x121   : > { %1380 = vmatpush3.bf16.msra.mxu0 %v1538_v46 }
 0x1d7   : > { %v680_v21 = vpop.f32.mrb[0].mxu0 }
 0x1d8   : > { %v681_v22 = vadd.f32 %v1246_v19, %v680_v21  ;;  %v1343_v23 = vpop.f32.mrb[1].mxu0 }
 0x1d9   : > { %v683_v24 = vpop.f32.mrb[2].mxu0 }
 0x1da   : > { %v686_v25 = vadd.f32 %v681_v22, %v540_v20  ;;  %v1344_v26 = vpop.f32.mrb[3].mxu0 }
 0x1dc   : > { %v687_v27 = vmul.f32 0.70710677, %v686_v25 }
 0x1de   : > { %v688_v28 = vpack.c.bf16 %v687_v27, %v687_v27 }
 0x1e0   : > { %1362 = vmatmul.mubr.bf16.vlgmr.msra.gmra.mrb[0].mxu1 %v688_v28 }
 0x1e1   : > { %1401 = vmatprep.mubr.msk.bf16.mxu1 %vm1885_vm0, %v1884_v0  ;;  %1386 = vmatpush3.bf16.msra.mxu1 %v1539_v47 }
 0x1e2   : > { %1387 = vmatprep.subr.bf16.mxu1 %v1884_v0 }
 0x1e5   : > { %1388 = vmatpush3.bf16.msra.mxu1 %v1540_v48 }
 0x1e6   : > { %1389 = vmatprep.subr.bf16.mxu1 %v1884_v0 }
 0x1e9   : > { %1390 = vmatpush3.bf16.msra.mxu1 %v1541_v49 }
 0x1ea   : > { %1391 = vmatprep.subr.bf16.mxu1 %v1884_v0 }
 0x1ed   : > { %1392 = vmatpush3.bf16.msra.mxu1 %v1542_v50 }
 0x1ee   : > { %1393 = vmatprep.subr.bf16.mxu1 %v1884_v0 }
 0x1f1   : > { %1394 = vmatpush3.bf16.msra.mxu1 %v1543_v51 }
 0x1f2   : > { %1395 = vmatprep.subr.bf16.mxu1 %v1884_v0 }
 0x1f5   : > { %1396 = vmatpush3.bf16.msra.mxu1 %v1544_v52 }
 0x1f6   : > { %1397 = vmatprep.subr.bf16.mxu1 %v1884_v0 }
 0x1f9   : > { %1398 = vmatpush3.bf16.msra.mxu1 %v1545_v53 }
 0x1fa   : > { %1399 = vmatprep.subr.bf16.mxu1 %v1884_v0 }
 0x1fd   : > { %1400 = vmatpush3.bf16.msra.mxu1 %v1546_v58 }
 0x2b3   : > { %v777_v30 = vpop.f32.mrb[0].mxu1 }
 0x2b4   : > { %v778_v31 = vadd.f32 %v1255_v29, %v777_v30  ;;  %v1363_v32 = vpop.f32.mrb[1].mxu1 }
 0x2b5   : > { %v780_v33 = vpop.f32.mrb[2].mxu1 }
 0x2b6   : > { %783 = vmax.xlane.f32.xlu0 %v778_v31  ;;  %v1364_v34 = vpop.f32.mrb[3].mxu1 }
 0x343   : > { %v784_v39 = vpop.xlane.xlu0 %783 }
 0x344   : > { %v785_v40 = vsub.f32 %v778_v31, %v784_v39 }
 0x346   : > { %v786_v41 = vmul.f32 1.442695, %v785_v40 }
 0x348   : > { %1547 = vpow2.f32 %v786_v41 }
 0x352   : > { %v1548_v42 = vpop.eup %1547 }
 0x353   : > { %788 = vadd.xlane.f32.xlu0 %v1548_v42 }
 0x3e0   : > { %v789_v54 = vpop.xlane.xlu0 %788 }
 0x3e1   : > { %1549 = vrcp.f32 %v789_v54 }
 0x3eb   : > { %v1550_v55 = vpop.eup %1549 }
 0x3ec   : > { %v791_v56 = vmul.f32 %v1550_v55, %v1548_v42 }
 0x3ee   : > { %v792_v57 = vpack.c.bf16 %v791_v56, %v791_v56 }
 0x3f0   : > { %1382 = vmatmul.mubr.bf16.vlgmr.msra.gmra.mrb[4].mxu0 %v792_v57  ;;  %793 = vst [vmem:[%s534_s8] sm:$0xf] %v792_v57 }
 0x4c3   : > { %v876_v60 = vpop.f32.mrb[4].mxu0 }
 0x4c4   : > { %v884_v61 = vmul.f32 %v883_v59, %v876_v60  ;;  %v1383_v62 = vpop.f32.mrb[5].mxu0 }
 0x4c5   : > { %v879_v63 = vpop.f32.mrb[6].mxu0 }
 0x4c6   : > { %v885_v0 = vpack.c.bf16 %v884_v61, %v884_v61  ;;  %v1384_v1 = vpop.f32.mrb[7].mxu0 }
 0x4c8   : > { %1402 = vmatmul.mubr.bf16.vlgmr.msra.gmra.mrb[4].mxu1 %v885_v0 }
 0x4c9   : > { %1750 = shalt.err (!%p1747_p0)
}
 0x4ca   : > { %s1751_s21 = scalar_lea.hbm %s2337_s18, 64  ;;  %s1755_s3 = scalar_lea.hbm %s2468_s22, 128 }
 0x4cb   : > { %p1752_p5 = scmp.ne.s32.totalorder %s2337_s18, %s1751_s21  ;;  %p1756_p6 = scmp.lt.u32.totalorder %s2337_s18, %s2468_s22 }
 0x4cc   : > { %p1757_p7 = scmp.lt.u32.totalorder %s1755_s3, %s1751_s21  ;;  %p1759_p3 = scmp.lt.u32.totalorder %s1751_s21, %s2337_s18 }
 0x4cd   : > { %p1753_p4 = pnand %p1752_p5, %p2469_p8 }
 0x4ce   : > { %p1758_p11 = por %p1757_p7, %p1756_p6 }
 0x4cf   : > { %p1754_p10 = pneg %p1753_p4 }
 0x4d0   : > { %p1760_p12 = por %p1759_p3, %p1758_p11 }
 0x4d2   : > { %p1761_p9 = pnand %p1760_p12, %p1754_p10 }
 0x4d4   : > { %1764 = shalt.err (!%p1761_p9)
}
 0x4d5   : > { %1422 = dma.vmem_to_hbm [thread:$0]  (%p2469_p8), %s1035_s19, 64, %s2337_s18, %s1006_s25  }
 0x4d6   : > { %s2470_s14 = sld [smem:[#allocation33_spill]]  ;;  %s1283_s10 = sshll.u32 %s1865_s0, 7 }
 0x4d7   : > { %s527_s13 = scalar_lea.vmem [#allocation15], %s2245_s4  ;;  %s2471_s27 = sld [smem:[#allocation34_spill]] }
 0x4d8   : > { %s1020_s15 = sshll.u32 %s527_s13, 4  ;;  %s1001_s18 = scalar_lea.sflag [#allocation6], %s2242_s26  ;;  %s2368_s15 = int_to_ptr.vmem [resolvable:$true] %s1020_s15 }
 0x4d9   : > { %s1765_s25 = scalar_lea.vmem %s2368_s15, 128  ;;  %s1887_s0 = smov [#allocation15]  }
 0x4da   : > { %p1766_p13 = scmp.ne.s32.totalorder %s2368_s15, %s1765_s25  ;;  %s1769_s4 = sshll.u32 %s1887_s0, 4  ;;  %s1770_s4 = int_to_ptr.vmem [resolvable:$false] %s1769_s4 }
 0x4db   : > { %s1771_s3 = scalar_lea.vmem %s1770_s4, 256  ;;  %p1772_p0 = scmp.lt.s32.totalorder %s2368_s15, %s1770_s4 }
 0x4dc   : > { %v1272_v2 = vld [vmem:[%s2470_s14] ss:$0 sm:$0xff]  ;;  %p1767_p1 = pnand %p1766_p13, %p2469_p8  ;;  %p1773_p5 = scmp.lt.s32.totalorder %s1771_s3, %s1765_s25 }
 0x4dd   : > { %s2472_s24 = smov %s2471_s27  ;;  %s2366_s19 = scalar_lea.hbm %s2471_s27, %s1283_s10 }
 0x4de   : > { %p1768_p2 = pneg %p1767_p1  ;;  %p1774_p4 = por %p1773_p5, %p1772_p0 }
 0x4e0   : > { %p1775_p10 = pnand %p1774_p4, %p1768_p2 }
 0x59b   : > { %v991_v3 = vpop.f32.mrb[4].mxu1 }
 0x59c   : > { %v992_v4 = vadd.f32 %v1272_v2, %v991_v3  ;;  %v1403_v5 = vpop.f32.mrb[5].mxu1 }
 0x59d   : > { %v994_v6 = vpop.f32.mrb[6].mxu1 }
 0x59e   : > { %v997_v7 = vadd.f32 %v992_v4, %v2292_v14  ;;  %v1404_v8 = vpop.f32.mrb[7].mxu1 }
 0x5a0   : > { %v998_v9 = vmul.f32 0.70710677, %v997_v7 }
 0x5a2   : > { %999 = vst [vmem:[%s527_s13] sm:$0xff] %v998_v9 }
 0x5a3   : > { %1778 = shalt.err (!%p1775_p10)
}
 0x5a4   : > { %s1779_s26 = scalar_lea.hbm %s2366_s19, 128  ;;  %s1783_s20 = scalar_lea.hbm %s2472_s24, 256 }
 0x5a5   : > { %p1780_p6 = scmp.ne.s32.totalorder %s2366_s19, %s1779_s26  ;;  %p1784_p3 = scmp.lt.u32.totalorder %s2366_s19, %s2472_s24 }
 0x5a6   : > { %p1785_p12 = scmp.lt.u32.totalorder %s1783_s20, %s1779_s26  ;;  %p1787_p13 = scmp.lt.u32.totalorder %s1779_s26, %s2366_s19 }
 0x5a7   : > { %p1781_p7 = pnand %p1780_p6, %p2469_p8 }
 0x5a8   : > { %p1786_p9 = por %p1785_p12, %p1784_p3 }
 0x5a9   : > { %p1782_p11 = pneg %p1781_p7 }
 0x5aa   : > { %p1788_p1 = por %p1787_p13, %p1786_p9 }
 0x5ac   : > { %p1789_p2 = pnand %p1788_p1, %p1782_p11 }
 0x5ae   : > { %1792 = shalt.err (!%p1789_p2)
}
 0x5af   : > { %1421 = dma.vmem_to_hbm [thread:$0]  (%p2469_p8), %s2368_s15, 128, %s2366_s19, %s1001_s18  }
 0x5b0 PF: > { %s2473_s10 = sld [smem:[#allocation27_spill]]  ;;  %s2474_s13 = sld [smem:[#allocation28_spill]] }
 0x5b1   : > { %p2476_p5 = scmp.ge.s32.totalorder %s1873_s12, 2 }
 0x5b6   : > { %s1046_s6 = sand.u32 1, %s2473_s10   ;;  %p2475_p0 = scmp.ne.s32.totalorder %s2474_s13, 0 }
 0x5b7   : > { %s1047_s21 = scalar_lea.sflag [#allocation6], %s1046_s6 }
 0x5b8   : > { %p1446_p4 = pnand %p2476_p5, %p2475_p0 }
 0x5ba   : > { %1844 = dma.done.wait (!%p1446_p4), %s1047_s21, 128  }
 0x5bb   : > { %1846 = vsyncadd (!%p1446_p4), %s1047_s21, 4294967168  ;;  %s1056_s27 = scalar_lea.sflag [#allocation17], %s1046_s6 }
 0x5bc   : > { %1848 = dma.done.wait (!%p1446_p4), %s1056_s27, 64  }
 0x5bd   : > { %1850 = vsyncadd (!%p1446_p4), %s1056_s27, 4294967232  ;;  %s40_s12 = sadd.s32 1, %s1873_s12   ;;  %s2477_s27 = smov %s1857_s28 }
 0x5be   : > { %p37_p10 = scmp.ge.s32.totalorder %s40_s12, 4   ;;  %s2478_s28 = smov %s1861_s29 }
 0x5bf   : > { %s2479_s29 = smov %s2169_s23  ;;  %s2480_s0 = smov %s1869_s30 }
 0x5c0   : > { %s2481_s30 = smov %s2483_s17  ;;  %39 = sbr.rel (!%p37_p10) target bundleno = 26 (0x1a), region = 152 }
 0x5c7   :  { %1061 = vsyncpa [#allocation5], 1 }
 0x5c8   :  { %1063 = vsyncpa [#allocation5 + $0x1], 1 }
 0x5c9   :  { %1064 = vsyncpa [#allocation8], 1 }
 0x5ca   :  { %1066 = vsyncpa [#allocation8 + $0x1], 1 }
 0x5cb   :  { %1067 = vsyncpa [#allocation11], 1 }
 0x5cc   :  { %1068 = vsyncpa [#allocation14], 1 }
 0x5cd   :  { %1069 = vsyncpa [#allocation6], 1 }
 0x5ce   :  { %1071 = vsyncpa [#allocation6 + $0x1], 1 }
 0x5cf   :  { %1072 = vsyncpa [#allocation17], 1 }
 0x5d0   :  { %1074 = vsyncpa [#allocation17 + $0x1], 1 }

</bundles_post_ra>
